<compile_context>
chip_gen: v7x
topology: tpu7x:2x2x1
jax: 0.10.0
libtpu: 0.0.40
codegen_flags: <defaults>
</compile_context>

<pallas_src>
import jax
import jax.numpy as jnp
from jax.experimental import pallas as pl
from jax.experimental.pallas import tpu as pltpu


# ---------------------------------------------------------------------------
# Kernels
# ---------------------------------------------------------------------------

def _affine_cl_kernel(x_ref, w_ref, b_ref, o_ref):
    """Channel-last tile: (R, K) @ (K, N) + bias(1, N).

    Used both for the packed path (K = N = 128, block-diagonal fused weight) and for the
    generic fallback (K = N = in_dim)."""
    acc = jnp.dot(x_ref[...], w_ref[...], preferred_element_type=jnp.float32)
    o_ref[...] = (acc + b_ref[...]).astype(o_ref.dtype)


def _packed_cf_kernel(x_ref, m_ref, b_ref, o_ref):
    """NCHW path: channel-first input block, lane-dense packed channel-last output.

    x_ref : (1, d, R, p)  channel-first tokens, p = 128 // d tokens per packed row
    m_ref : (d, p, 128)   M[c, k, j] = W_fused[c, j % d] * (k == j // d)
    b_ref : (1, 128)      bias tiled p times (f32)
    o_ref : (1, R, 128)   row r = tokens [p*r, p*(r+1)) channel-interleaved
    The d small matmuls do the layout change on the MXU, so no XLA transpose pass and the
    store DMA is fully lane-dense."""
    d = x_ref.shape[1]
    acc = jnp.dot(x_ref[0, 0], m_ref[0], preferred_element_type=jnp.float32)
    for c in range(1, d):  # d is tiny and static -> unrolled at trace time
        acc = acc + jnp.dot(x_ref[0, c], m_ref[c], preferred_element_type=jnp.float32)
    o_ref[0] = (acc + b_ref[...]).astype(o_ref.dtype)


# ---------------------------------------------------------------------------
# Wrapper helpers
# ---------------------------------------------------------------------------

def _fused_affine_params(w_pre, b_pre, w_post, b_post):
    """Fold the two bias-carrying 1x1 convs into one affine map (valid: no activation)."""
    hidden, in_dim = w_pre.shape[0], w_pre.shape[1]
    w1 = w_pre.reshape(hidden, in_dim).astype(jnp.float32).T     # (in_dim, hidden)
    w2 = w_post.reshape(in_dim, hidden).astype(jnp.float32).T    # (hidden, in_dim)
    w_fused = w1 @ w2                                            # (in_dim, in_dim) f32
    b_fused = b_pre.astype(jnp.float32) @ w2 + b_post.astype(jnp.float32)   # (in_dim,) f32
    return w_fused, b_fused


def _round_up(v, m):
    return (v + m - 1) // m * m


def _pick_row_tile(total_rows, max_rows):
    """Rows per block: multiple of 8 (or the full extent), and at least 2 blocks whenever
    there is meaningful work so v7x's two TensorCores both get grid blocks."""
    if total_rows >= 2 * max_rows:
        return max_rows
    if total_rows >= 16:
        return _round_up(pl.cdiv(total_rows, 2), 8)
    return total_rows


def _vmem_limit(*padded_block_bytes):
    """Actual double-buffered footprint + slack, floored/capped to a safe range
    (<= v7x scoped default of 32 MiB; well under 64/128 MiB physical)."""
    need = 2 * sum(padded_block_bytes) + (2 << 20)
    return int(min(32 << 20, max(need, 16 << 20)))


# ---------------------------------------------------------------------------
# Paths
# ---------------------------------------------------------------------------

def _affine_tokens_packed(x_flat, w_fused, b_fused, *, max_rows=4096):
    """Token input (n_tok, d) with d | 128: repack to 128-lane rows (free reshape) and use
    a block-diagonal 128x128 fused weight so loads, MXU and stores are lane-dense."""
    n_tok, d = x_flat.shape
    p = 128 // d
    n_pad = _round_up(n_tok, p)
    if n_pad != n_tok:
        x_flat = jnp.pad(x_flat, ((0, n_pad - n_tok), (0, 0)))
    rows = n_pad // p
    x_p = x_flat.reshape(rows, 128)                                       # free reshape
    w_big = jnp.kron(jnp.eye(p, dtype=jnp.float32), w_fused).astype(x_flat.dtype)
    b_big = jnp.tile(b_fused, p).reshape(1, 128)                          # f32

    tr = _pick_row_tile(rows, max_rows)
    grid = (pl.cdiv(rows, tr),)                    # ragged last block masked by Pallas
    blk = tr * 128 * x_flat.dtype.itemsize
    out_p = pl.pallas_call(
        _affine_cl_kernel,
        out_shape=jax.ShapeDtypeStruct((rows, 128), x_flat.dtype),
        grid=grid,
        in_specs=[
            pl.BlockSpec((tr, 128), lambda i: (i, 0)),
            pl.BlockSpec((128, 128), lambda i: (0, 0)),
            pl.BlockSpec((1, 128), lambda i: (0, 0)),
        ],
        out_specs=pl.BlockSpec((tr, 128), lambda i: (i, 0)),
        compiler_params=pltpu.CompilerParams(
            dimension_semantics=("parallel",),
            vmem_limit_bytes=_vmem_limit(blk, blk)),
    )(x_p, w_big, b_big)

    out = out_p.reshape(n_pad, d)                                         # free reshape
    return out[:n_tok] if n_pad != n_tok else out


def _affine_tokens_plain(x_flat, w_fused, b_fused):
    """Generic fallback (in_dim does not divide 128): channel-last (tile, d) @ (d, d)."""
    n_tok, d = x_flat.shape
    itemsize = x_flat.dtype.itemsize
    lane_bytes = _round_up(d, 128) * itemsize            # VMEM lane padding of the block
    tm_cap = max(8, ((1 << 20) // lane_bytes) // 8 * 8)  # ~1 MiB (padded) per block
    tm = n_tok if n_tok <= tm_cap else tm_cap
    grid = (pl.cdiv(n_tok, tm),)
    blk = tm * lane_bytes
    return pl.pallas_call(
        _affine_cl_kernel,
        out_shape=jax.ShapeDtypeStruct((n_tok, d), x_flat.dtype),
        grid=grid,
        in_specs=[
            pl.BlockSpec((tm, d), lambda i: (i, 0)),
            pl.BlockSpec((d, d), lambda i: (0, 0)),
            pl.BlockSpec((1, d), lambda i: (0, 0)),
        ],
        out_specs=pl.BlockSpec((tm, d), lambda i: (i, 0)),
        compiler_params=pltpu.CompilerParams(
            dimension_semantics=("parallel",),
            vmem_limit_bytes=_vmem_limit(blk, blk)),
    )(x_flat, w_fused.astype(x_flat.dtype), b_fused.reshape(1, d))


def _affine_nchw_packed(x_cf, w_fused, b_fused, *, max_rows=1024):
    """NCHW input (b, d, hw) with d | 128: fused matmul + in-kernel layout change; the
    output is written as lane-dense packed channel-last rows, so there is no extra
    wrapper-side transpose pass over HBM."""
    b, d, hw = x_cf.shape
    p = 128 // d
    hw_pad = _round_up(hw, p)
    if hw_pad != hw:
        x_cf = jnp.pad(x_cf, ((0, 0), (0, 0), (0, hw_pad - hw)))
    rows = hw_pad // p
    x4 = x_cf.reshape(b, d, rows, p)                                      # free reshape

    # M[c, k, j] = W_fused[c, j % d] * (k == j // d): the MXU applies W and interleaves
    # tokens/channels into the packed row-major output layout in the same pass.
    eye_p = jnp.eye(p, dtype=jnp.float32)
    m = (w_fused[:, None, None, :] * eye_p[None, :, :, None]).reshape(d, p, 128)
    m = m.astype(x_cf.dtype)
    b_big = jnp.tile(b_fused, p).reshape(1, 128)                          # f32

    tr = _pick_row_tile(rows, max_rows)
    grid = (b, pl.cdiv(rows, tr))                  # both axes fully parallel (no reduction)
    x_blk = d * tr * 128 * x_cf.dtype.itemsize     # lane-padded (p -> 128) VMEM footprint
    o_blk = tr * 128 * x_cf.dtype.itemsize
    out_p = pl.pallas_call(
        _packed_cf_kernel,
        out_shape=jax.ShapeDtypeStruct((b, rows, 128), x_cf.dtype),
        grid=grid,
        in_specs=[
            pl.BlockSpec((1, d, tr, p), lambda bi, ri: (bi, 0, ri, 0)),
            pl.BlockSpec((d, p, 128), lambda bi, ri: (0, 0, 0)),
            pl.BlockSpec((1, 128), lambda bi, ri: (0, 0)),
        ],
        out_specs=pl.BlockSpec((1, tr, 128), lambda bi, ri: (bi, ri, 0)),
        compiler_params=pltpu.CompilerParams(
            dimension_semantics=("parallel", "parallel"),
            vmem_limit_bytes=_vmem_limit(x_blk, o_blk)),
    )(x4, m, b_big)

    out = out_p.reshape(b, hw_pad, d)                                     # free reshape
    return out[:, :hw, :] if hw_pad != hw else out


def affine_net_forward(x, w_pre, b_pre, w_post, b_post):
    """Pallas implementation of AffineNet.forward.

    x      : NCHW (b, in_dim, h, w) or tokens (b, h*w, in_dim) -- same as PyTorch.
    w_pre  : (hidden, in_dim, 1, 1), b_pre : (hidden,)
    w_post : (in_dim, hidden, 1, 1), b_post: (in_dim,)
    returns: (b, h*w, in_dim)
    """
    in_dim = w_pre.shape[1]
    w_fused, b_fused = _fused_affine_params(w_pre, b_pre, w_post, b_post)
    packable = (in_dim < 128) and (128 % in_dim == 0)

    if x.ndim == 4:
        b, d, h, w = x.shape
        assert d == in_dim
        hw = h * w
        x_cf = x.reshape(b, d, hw)                   # 'b d h w -> b d (h w)', free reshape
        if packable:
            return _affine_nchw_packed(x_cf, w_fused, b_fused)
        # Fallback (in_dim doesn't divide 128): layout change in XLA, generic CL kernel.
        x_tok = jnp.transpose(x_cf, (0, 2, 1)).reshape(b * hw, d)
        return _affine_tokens_plain(x_tok, w_fused, b_fused).reshape(b, hw, d)

    # 3-D token input 'b (h w) d': a 1x1 conv never looks at spatial layout, so the
    # PyTorch round-trip rearrange is a pure layout no-op -- operate on tokens directly.
    b, hw, d = x.shape
    assert d == in_dim
    x_flat = x.reshape(b * hw, d)
    if packable:
        out = _affine_tokens_packed(x_flat, w_fused, b_fused)
    else:
        out = _affine_tokens_plain(x_flat, w_fused, b_fused)
    return out.reshape(b, hw, d)


# ---------------------------------------------------------------------------
# Demo / correctness check
# ---------------------------------------------------------------------------

if __name__ == "__main__":
    B, IN_DIM, H, W = 2, 4, 16, 16
    HIDDEN = 32

    key = jax.random.PRNGKey(0)
    kx, k1, k2, k3, k4 = jax.random.split(key, 5)

    x = jax.random.normal(kx, (B, IN_DIM, H, W), dtype=jnp.float32)
    # Parameter shapes match nn.Conv2d(in, out, (1, 1)).
    w_pre = jax.random.normal(k1, (HIDDEN, IN_DIM, 1, 1), dtype=jnp.float32) * 0.1
    b_pre = jax.random.normal(k2, (HIDDEN,), dtype=jnp.float32) * 0.1
    w_post = jax.random.normal(k3, (IN_DIM, HIDDEN, 1, 1), dtype=jnp.float32) * 0.1
    b_post = jax.random.normal(k4, (IN_DIM,), dtype=jnp.float32) * 0.1

    out = jax.block_until_ready(affine_net_forward(x, w_pre, b_pre, w_post, b_post))

    # Reference in plain JAX: two unfused 1x1 convs == two channel matmuls.
    x_tok = jnp.transpose(x, (0, 2, 3, 1)).reshape(B, H * W, IN_DIM)
    h_ref = x_tok @ w_pre.reshape(HIDDEN, IN_DIM).T + b_pre
    out_ref = h_ref @ w_post.reshape(IN_DIM, HIDDEN).T + b_post

    assert out.shape == (B, H * W, IN_DIM)
    assert jnp.allclose(out, out_ref, atol=1e-4, rtol=1e-4)

    # Also exercise the 3-D token-input path of the module.
    out_tok = jax.block_until_ready(
        affine_net_forward(x_tok, w_pre, b_pre, w_post, b_post))
    assert out_tok.shape == (B, H * W, IN_DIM)
    assert jnp.allclose(out_tok, out_ref, atol=1e-4, rtol=1e-4)

    print("KERNEL_OK")
</pallas_src>

<mosaic_0001>
module attributes {stable_mosaic.version = 11 : i64} {
  func.func @_packed_cf_kernel(%arg0: i32, %arg1: i32, %arg2: memref<1x4x8x32xf32, #tpu.memory_space<vmem>>, %arg3: memref<4x32x128xf32, #tpu.memory_space<vmem>>, %arg4: memref<1x128xf32, #tpu.memory_space<vmem>>, %arg5: memref<1x8x128xf32, #tpu.memory_space<vmem>>) attributes {dimension_semantics = [#tpu.dimension_semantics<parallel>, #tpu.dimension_semantics<parallel>], iteration_bounds = array<i64: 2, 1>, scalar_prefetch = 0 : i64, scratch_operands = 0 : i64, tpu.core_type = #tpu.core_type<tc>, window_params = [{transform_indices = @transform_0, window_bounds = array<i64: 1, 4, 8, 32>}, {pipeline_mode = #tpu.pipeline_mode<synchronous>, transform_indices = @transform_1, window_bounds = array<i64: 4, 32, 128>}, {pipeline_mode = #tpu.pipeline_mode<synchronous>, transform_indices = @transform_2, window_bounds = array<i64: 1, 128>}, {transform_indices = @transform_3, window_bounds = array<i64: 1, 8, 128>}]} {
    %c0 = arith.constant 0 : index
    %c0_0 = arith.constant 0 : index
    %c0_1 = arith.constant 0 : index
    %c0_2 = arith.constant 0 : index
    %0 = vector.load %arg2[%c0, %c0_0, %c0_1, %c0_2] : memref<1x4x8x32xf32, #tpu.memory_space<vmem>>, vector<1x1x8x32xf32>
    %1 = vector.shape_cast %0 : vector<1x1x8x32xf32> to vector<8x32xf32>
    %c0_3 = arith.constant 0 : index
    %c0_4 = arith.constant 0 : index
    %c0_5 = arith.constant 0 : index
    %2 = vector.load %arg3[%c0_3, %c0_4, %c0_5] : memref<4x32x128xf32, #tpu.memory_space<vmem>>, vector<1x32x128xf32>
    %3 = vector.shape_cast %2 : vector<1x32x128xf32> to vector<32x128xf32>
    %cst = arith.constant dense<0.000000e+00> : vector<8x128xf32>
    %4 = tpu.matmul %1, %3, %cst {dimension_numbers = #tpu.dot_dimension_numbers<[1], [0], [0], [1], [0, 0, 1, 1], [], []>} : vector<8x32xf32>, vector<32x128xf32>, vector<8x128xf32> -> vector<8x128xf32>
    %c0_6 = arith.constant 0 : index
    %c1 = arith.constant 1 : index
    %c0_7 = arith.constant 0 : index
    %c0_8 = arith.constant 0 : index
    %5 = vector.load %arg2[%c0_6, %c1, %c0_7, %c0_8] : memref<1x4x8x32xf32, #tpu.memory_space<vmem>>, vector<1x1x8x32xf32>
    %6 = vector.shape_cast %5 : vector<1x1x8x32xf32> to vector<8x32xf32>
    %c1_9 = arith.constant 1 : index
    %c0_10 = arith.constant 0 : index
    %c0_11 = arith.constant 0 : index
    %7 = vector.load %arg3[%c1_9, %c0_10, %c0_11] : memref<4x32x128xf32, #tpu.memory_space<vmem>>, vector<1x32x128xf32>
    %8 = vector.shape_cast %7 : vector<1x32x128xf32> to vector<32x128xf32>
    %cst_12 = arith.constant dense<0.000000e+00> : vector<8x128xf32>
    %9 = tpu.matmul %6, %8, %cst_12 {dimension_numbers = #tpu.dot_dimension_numbers<[1], [0], [0], [1], [0, 0, 1, 1], [], []>} : vector<8x32xf32>, vector<32x128xf32>, vector<8x128xf32> -> vector<8x128xf32>
    %10 = arith.addf %4, %9 : vector<8x128xf32>
    %c0_13 = arith.constant 0 : index
    %c2 = arith.constant 2 : index
    %c0_14 = arith.constant 0 : index
    %c0_15 = arith.constant 0 : index
    %11 = vector.load %arg2[%c0_13, %c2, %c0_14, %c0_15] : memref<1x4x8x32xf32, #tpu.memory_space<vmem>>, vector<1x1x8x32xf32>
    %12 = vector.shape_cast %11 : vector<1x1x8x32xf32> to vector<8x32xf32>
    %c2_16 = arith.constant 2 : index
    %c0_17 = arith.constant 0 : index
    %c0_18 = arith.constant 0 : index
    %13 = vector.load %arg3[%c2_16, %c0_17, %c0_18] : memref<4x32x128xf32, #tpu.memory_space<vmem>>, vector<1x32x128xf32>
    %14 = vector.shape_cast %13 : vector<1x32x128xf32> to vector<32x128xf32>
    %cst_19 = arith.constant dense<0.000000e+00> : vector<8x128xf32>
    %15 = tpu.matmul %12, %14, %cst_19 {dimension_numbers = #tpu.dot_dimension_numbers<[1], [0], [0], [1], [0, 0, 1, 1], [], []>} : vector<8x32xf32>, vector<32x128xf32>, vector<8x128xf32> -> vector<8x128xf32>
    %16 = arith.addf %10, %15 : vector<8x128xf32>
    %c0_20 = arith.constant 0 : index
    %c3 = arith.constant 3 : index
    %c0_21 = arith.constant 0 : index
    %c0_22 = arith.constant 0 : index
    %17 = vector.load %arg2[%c0_20, %c3, %c0_21, %c0_22] : memref<1x4x8x32xf32, #tpu.memory_space<vmem>>, vector<1x1x8x32xf32>
    %18 = vector.shape_cast %17 : vector<1x1x8x32xf32> to vector<8x32xf32>
    %c3_23 = arith.constant 3 : index
    %c0_24 = arith.constant 0 : index
    %c0_25 = arith.constant 0 : index
    %19 = vector.load %arg3[%c3_23, %c0_24, %c0_25] : memref<4x32x128xf32, #tpu.memory_space<vmem>>, vector<1x32x128xf32>
    %20 = vector.shape_cast %19 : vector<1x32x128xf32> to vector<32x128xf32>
    %cst_26 = arith.constant dense<0.000000e+00> : vector<8x128xf32>
    %21 = tpu.matmul %18, %20, %cst_26 {dimension_numbers = #tpu.dot_dimension_numbers<[1], [0], [0], [1], [0, 0, 1, 1], [], []>} : vector<8x32xf32>, vector<32x128xf32>, vector<8x128xf32> -> vector<8x128xf32>
    %22 = arith.addf %16, %21 : vector<8x128xf32>
    %c0_27 = arith.constant 0 : index
    %c0_28 = arith.constant 0 : index
    %23 = vector.load %arg4[%c0_27, %c0_28] : memref<1x128xf32, #tpu.memory_space<vmem>>, vector<1x128xf32>
    %24 = vector.broadcast %23 : vector<1x128xf32> to vector<8x128xf32>
    %25 = arith.addf %22, %24 : vector<8x128xf32>
    %c0_29 = arith.constant 0 : index
    %c0_30 = arith.constant 0 : index
    %c0_31 = arith.constant 0 : index
    %26 = vector.load %arg5[%c0_29, %c0_30, %c0_31] : memref<1x8x128xf32, #tpu.memory_space<vmem>>, vector<1x8x128xf32>
    %27 = vector.shape_cast %26 : vector<1x8x128xf32> to vector<8x128xf32>
    %28 = vector.shape_cast %25 : vector<8x128xf32> to vector<1x8x128xf32>
    tpu.vector_store %arg5[%c0_29, %c0_30, %c0_31], %28 {strides = array<i32>} : memref<1x8x128xf32, #tpu.memory_space<vmem>>, vector<1x8x128xf32>,
    return
  }
  func.func @transform_0(%arg0: i32, %arg1: i32) -> (i32, i32, i32, i32) {
    %c0_i32 = arith.constant 0 : i32
    %c0_i32_0 = arith.constant 0 : i32
    %c0_i32_1 = arith.constant 0 : i32
    return %arg0, %c0_i32, %arg1, %c0_i32_0 : i32, i32, i32, i32
  }
  func.func @transform_1(%arg0: i32, %arg1: i32) -> (i32, i32, i32) {
    %c0_i32 = arith.constant 0 : i32
    %c0_i32_0 = arith.constant 0 : i32
    %c0_i32_1 = arith.constant 0 : i32
    %c0_i32_2 = arith.constant 0 : i32
    return %c0_i32, %c0_i32_0, %c0_i32_1 : i32, i32, i32
  }
  func.func @transform_2(%arg0: i32, %arg1: i32) -> (i32, i32) {
    %c0_i32 = arith.constant 0 : i32
    %c0_i32_0 = arith.constant 0 : i32
    %c0_i32_1 = arith.constant 0 : i32
    return %c0_i32, %c0_i32_0 : i32, i32
  }
  func.func @transform_3(%arg0: i32, %arg1: i32) -> (i32, i32, i32) {
    %c0_i32 = arith.constant 0 : i32
    %c0_i32_0 = arith.constant 0 : i32
    return %arg0, %arg1, %c0_i32 : i32, i32, i32
  }
}

</mosaic_0001>

<bundles_post_ra>
// kernel: tpu_custom_call.1
= control target key start
LH: loop header
LB: loop body
LE: loop exit
PB: predicated region body
PF: predicated region fallthrough
CT: control target
= control target key end

     0   :  { %8 = vsyncpa [#allocation3], 0  ;;  %s1263_s0 = inlined_call_operand.hbm [shape: f32[2,4,8,32], index: 0, kind: input, shape index: {}]   ;;  %s1264_s1 = inlined_call_operand.hbm [shape: f32[4,32,128], index: 1, kind: input, shape index: {}]   ;;  %s1265_s2 = inlined_call_operand.vmem [shape: f32[1,128], index: 2, kind: input, shape index: {}]   ;;  %s1266_s3 = inlined_call_operand.hbm [shape: f32[2,8,128], index: 3, kind: output, shape index: {}]  }
   0x1   :  { %10 = vsyncpa [#allocation3 + $0x1], 0 }
   0x2   :  { %11 = vsyncpa [#allocation6], 0 }
   0x3   :  { %12 = vsyncpa [#allocation4], 0 }
   0x4   :  { %14 = vsyncpa [#allocation4 + $0x1], 0  ;;  %s1022_s12 = smov 0   ;;  %s1024_s13 = smov 0  }
   0x5   :  { %s1026_s14 = smov 0   ;;  %s1028_s15 = smov 0  }
   0x6   :  { %s1030_s16 = smov 0   ;;  %s1032_s17 = smov 0  }
   0x7 LB: > { %s657_s18 = sadd.s32 4294967295, %s992_s17   ;;  %s658_s19 = sadd.s32 4294967294, %s992_s17   ;;  %s992_s17 = sphi %s1032_s17, %s20_s17   ;;  %s988_s16 = sphi %s1030_s16, %s1290_s16   ;;  %s984_s15 = sphi %s1028_s15, %s1289_s15   ;;  %s980_s14 = sphi %s1026_s14, %s1288_s14   ;;  %s976_s13 = sphi %s1024_s13, %s1287_s13   ;;  %s972_s12 = sphi %s1022_s12, %s1286_s12  }
   0x8   : > { %p54_p0 = scmp.ne.s32.totalorder %s976_s13, %s972_s12  ;;  %p1056_p1 = scmp.eq.s32.totalorder %s657_s18, 0 }
   0x9   : > { %p1060_p2 = scmp.eq.s32.totalorder %s657_s18, 1  ;;  %p128_p3 = scmp.eq.s32.totalorder %s658_s19, 1 }
   0xa   : > { %s1271_s20 = scalar_select %p1056_p1, 1, 0 }
   0xb   : > { %s1272_s21 = scalar_select %p1060_p2, 1, 0 }
   0xc   : > { %p1066_p4 = por %p1056_p1, %p54_p0  ;;  %p659_p5 = scmp.ge.s32.totalorder %s992_s17, 1 }
   0xd   : > { %p1071_p6 = por %p128_p3, %p54_p0  ;;  %p135_p7 = scmp.lt.s32.totalorder %s992_s17, 3 }
   0xe   : > { %s1273_s22 = scalar_select %p1066_p4, 1, 0 }
   0xf   : > { %s1274_s23 = scalar_select %p1071_p6, 1, 0 }
  0x10   : > { %p1076_p8 = pnand %p659_p5, %p135_p7  ;;  %s994_s25 = smov [#allocation5]  }
  0x11   : > { %s147_s26 = sshll.u32 %s994_s25, 4  ;;  %s32_s28 = sadd.s32 1, %s988_s16  ;;  %s148_s26 = int_to_ptr.vmem [resolvable:$true] %s147_s26 }
  0x12   : > { %s1275_s24 = scalar_select %p1076_p8, 1, 0 }
  0x13   : > { %p778_p9 = pneg %p1076_p8  ;;  %s848_s4 = scalar_lea.hbm %s1264_s1, 2048 }
  0x14   : > { %p849_p12 = scmp.ne.s32.totalorder %s1264_s1, %s848_s4  ;;  %p855_p5 = scmp.lt.u32.totalorder %s848_s4, %s1264_s1 }
  0x15   : > { %p1085_p11 = pnand %p778_p9, %p1056_p1 }
  0x17   : > { %p850_p13 = pneg %p1085_p11 }
  0x19   : > { %p851_p0 = pnand %p850_p13, %p849_p12 }
  0x1b   : > { %p852_p3 = pneg %p851_p0 }
  0x1d   : > { %p857_p7 = pnand %p855_p5, %p852_p3 }
  0x1f   : > { %860 = shalt.err (!%p857_p7)
}
  0x20   : > { %s861_s9 = scalar_lea.vmem %s148_s26, 2048  ;;  %p869_p1 = scmp.lt.s32.totalorder %s148_s26, %s148_s26 }
  0x21   : > { %p862_p9 = scmp.ne.s32.totalorder %s148_s26, %s861_s9  ;;  %p870_p4 = scmp.lt.s32.totalorder %s861_s9, %s861_s9 }
  0x23   : > { %p864_p10 = pnand %p862_p9, %p850_p13  ;;  %p871_p8 = por %p870_p4, %p869_p1 }
  0x25   : > { %p865_p6 = pneg %p864_p10 }
  0x27   : > { %p872_p2 = pnand %p871_p8, %p865_p6 }
  0x29   : > { %875 = shalt.err (!%p872_p2)
}
  0x2a   : > { %s995_s10 = smov 128   ;;  %s996_s11 = smov 8  }
  0x2b   : > { %781 = dma.hbm_to_vmem [thread:$0]  (!%p1085_p11), %s1264_s1, 2048, %s148_s26, [#allocation6], %s995_s10, %s995_s10, %s996_s11  }
  0x2c   : > { %p34_p1 = scmp.ge.s32.totalorder %s32_s28, 2  ;;  %s41_s25 = sadd.s32 1, %s980_s14 }
  0x2d   : > { %p48_p2 = scmp.ne.s32.totalorder %s980_s14, %s976_s13  ;;  %p49_p4 = scmp.eq.s32.totalorder %s992_s17, 0 }
  0x2e   : > { %s1292_s28 = smov (%p34_p1, %s32_s28), 0  ;;  %p1278_p8 = scmp.ne.s32.totalorder %s1272_s21, 0 }
  0x2f   : > { %p1115_p6 = por %p49_p4, %p48_p2  ;;  %s36_s30 = ssub.s32 %s988_s16, %s1292_s28 }
  0x30   : > { %p1121_p10 = por %p1278_p8, %p48_p2  ;;  %p791_p12 = scmp.lt.s32.totalorder %s992_s17, 2 }
  0x31   : > { %p39_p11 = scmp.eq.s32.totalorder %s36_s30, 0  ;;  %s164_s26 = sand.u32 1, %s980_s14  }
  0x32   : > { %s662_s4 = sshll.u32 %s164_s26, 5  ;;  %s681_s6 = sshll.u32 %s988_s16, 9 }
  0x33   : > { %s1130_s5 = scalar_select %p39_p11, %s980_s14, %s41_s25  }
  0x34   : > { %s1136_s9 = scalar_lea.hbm %s1263_s0, %s681_s6  ;;  %s168_s21 = scalar_lea.vmem [#allocation2], %s662_s4 }
  0x35   : > { %s176_s18 = sshll.u32 %s168_s21, 4  ;;  %p1142_p13 = pnand %p791_p12, %p1115_p6  ;;  %s1138_s18 = int_to_ptr.vmem [resolvable:$true] %s176_s18 }
  0x36   : > { %s1146_s25 = scalar_lea.sflag [#allocation3], %s164_s26  ;;  %s876_s30 = scalar_lea.hbm %s1136_s9, 512 }
  0x37   : > { %p877_p0 = scmp.ne.s32.totalorder %s1136_s9, %s876_s30  ;;  %p878_p3 = pneg %p1142_p13 }
  0x38   : > { %s881_s29 = scalar_lea.hbm %s1263_s0, 1024  ;;  %p882_p9 = scmp.lt.u32.totalorder %s1136_s9, %s1263_s0 }
  0x39   : > { %p879_p5 = pnand %p878_p3, %p877_p0  ;;  %p883_p1 = scmp.lt.u32.totalorder %s881_s29, %s876_s30 }
  0x3a   : > { %p885_p4 = scmp.lt.u32.totalorder %s876_s30, %s1136_s9 }
  0x3b   : > { %p880_p7 = pneg %p879_p5  ;;  %p884_p2 = por %p883_p1, %p882_p9 }
  0x3d   : > { %p886_p6 = por %p885_p4, %p884_p2 }
  0x3f   : > { %p887_p8 = pnand %p886_p6, %p880_p7 }
  0x41   : > { %890 = shalt.err (!%p887_p8)
}
  0x42   : > { %s891_s26 = scalar_lea.vmem %s1138_s18, 512  ;;  %s997_s21 = smov [#allocation2]  }
  0x43   : > { %p892_p12 = scmp.ne.s32.totalorder %s1138_s18, %s891_s26  ;;  %s896_s4 = sshll.u32 %s997_s21, 4  ;;  %s897_s4 = int_to_ptr.vmem [resolvable:$false] %s896_s4 }
  0x44   : > { %s898_s6 = scalar_lea.vmem %s897_s4, 1024  ;;  %p899_p5 = scmp.lt.s32.totalorder %s1138_s18, %s897_s4 }
  0x45   : > { %p894_p11 = pnand %p892_p12, %p878_p3  ;;  %p900_p9 = scmp.lt.s32.totalorder %s898_s6, %s891_s26 }
  0x47   : > { %p895_p0 = pneg %p894_p11  ;;  %p901_p1 = por %p900_p9, %p899_p5 }
  0x49   : > { %p902_p2 = pnand %p901_p1, %p895_p0 }
  0x4b   : > { %905 = shalt.err (!%p902_p2)
}
  0x4c   : > { %785 = dma.hbm_to_vmem [thread:$0]  (!%p1142_p13), %s1136_s9, 512, %s1138_s18, %s1146_s25, %s995_s10, %s995_s10, %s996_s11  }
  0x4d   : > { %p1281_p3 = scmp.ne.s32.totalorder %s1275_s24, 0 }
  0x4e   : > { %s1180_s30 = sand.u32 (!%p1281_p3), 1, %s976_s13   ;;  %p1282_p7 = scmp.ne.s32.totalorder (!%p1281_p3), %s1273_s22, 0 }
  0x4f   : > { %188 = sbr.rel (%p1281_p3) target bundleno = 341 (0x155), region = 32  ;;  %s666_s29 = sshll.u32 (!%p1281_p3), %s1180_s30, 5 }
  0x50   : > { %s191_s7 = scalar_lea.sflag (!%p1281_p3), [#allocation3], %s1180_s30  ;;  %s1184_s8 = scalar_lea.vmem (!%p1281_p3), [#allocation2], %s666_s29 }
  0x56   : > { %959 = dma.done.wait (%p1282_p7), %s191_s7, 512  }
  0x57   : > { %961 = vsyncadd (%p1282_p7), %s191_s7, 4294966784  ;;  %p1283_p13 = scmp.ne.s32.totalorder %s1271_s20, 0 }
  0x59   : > { %963 = dma.done.wait (%p1283_p13), [#allocation6], 2048  }
  0x5a   : > { %965 = vsyncadd (%p1283_p13), [#allocation6], 4294965248  ;;  %v998_v0 = vmov 0.0|0.0   ;;  %vm999_vm0 = vmmov 0   ;;  %v1000_v1 = vmov 0.0   ;;  %v229_v2 = vld [vmem:[#allocation5 + $0x20] sm:$0xff] }
  0x5b   : > { %746 = vmatprep.subr.bf16.mxu0 %v998_v0  ;;  %752 = vmatprep.subr.bf16.mxu1 %v998_v0  ;;  %v230_v3 = vld [vmem:[#allocation5 + $0x28] sm:$0xff]  ;;  %v222_v4 = vld [vmem:[#allocation5] sm:$0xff]  ;;  %v231_v7 = vld [vmem:[#allocation5 + $0x30] sm:$0xff]  ;;  %vm233_vm1 = vcmask 261120   ;;  %s668_s20 = sshll.u32 %s1180_s30, 3  ;;  %s678_s10 = sshll.u32 %s984_s15, 7 }
  0x5c   : > { %710 = vmatprep.mubr.msk.f32.mxu0 %vm999_vm0, %v1000_v1  ;;  %721 = vmatprep.mubr.msk.f32.mxu1 %vm999_vm0, %v1000_v1  ;;  %v747_v5 = vpack.c.bf16 %v230_v3, %v229_v2  ;;  %v223_v6 = vld [vmem:[#allocation5 + $0x8] sm:$0xff]  ;;  %v232_v8 = vld [vmem:[#allocation5 + $0x38] sm:$0xff]  ;;  %v224_v10 = vld [vmem:[#allocation5 + $0x10] sm:$0xff]  ;;  %s220_s11 = scalar_lea.vmem [#allocation7], %s668_s20  ;;  %s1214_s25 = scalar_lea.hbm %s1266_s3, %s678_s10 }
  0x5d   : > { %v753_v9 = vpack.c.bf16 %v223_v6, %v222_v4  ;;  %v225_v11 = vld [vmem:[#allocation5 + $0x18] sm:$0xff]  ;;  %v750_v12 = vpack.c.bf16 %v232_v8, %v231_v7  ;;  %v383_v14 = vld [vmem:[#allocation5 + $0x40] sm:$0xff]  ;;  %v384_v15 = vld [vmem:[#allocation5 + $0x48] sm:$0xff]  ;;  %s566_s9 = sshll.u32 %s220_s11, 4  ;;  %s552_s26 = scalar_lea.sflag [#allocation4], %s1180_s30  ;;  %s1216_s9 = int_to_ptr.vmem [resolvable:$true] %s566_s9 }
  0x5e   : > { %748 = vmatpush3.bf16.msra.mxu0 %v747_v5  ;;  %v756_v13 = vpack.c.bf16 %v225_v11, %v224_v10  ;;  %v464_v16 = vld [vmem:[#allocation5 + $0x60] sm:$0xff]  ;;  %v465_v17 = vld [vmem:[#allocation5 + $0x68] sm:$0xff]  ;;  %v759_v19 = vpack.c.bf16 %v384_v15, %v383_v14  ;;  %v385_v22 = vld [vmem:[#allocation5 + $0x50] sm:$0xff]  ;;  %s906_s21 = scalar_lea.vmem %s1216_s9, 128  ;;  %s1001_s15 = smov [#allocation7]  }
  0x5f   : > { %754 = vmatpush3.bf16.msra.mxu1 %v753_v9  ;;  %749 = vmatprep.subr.bf16.mxu0 %v998_v0  ;;  %v669_v18 = vld [vmem:[%s1184_s8 + $0x8] sm:$0xff]  ;;  %v221_v20 = vld [vmem:[%s1184_s8] sm:$0xff]  ;;  %v765_v21 = vpack.c.bf16 %v465_v17, %v464_v16  ;;  %v386_v23 = vld [vmem:[#allocation5 + $0x58] sm:$0xff]  ;;  %p907_p4 = scmp.ne.s32.totalorder %s1216_s9, %s906_s21  ;;  %s910_s4 = sshll.u32 %s1001_s15, 4  ;;  %s911_s4 = int_to_ptr.vmem [resolvable:$false] %s910_s4 }
  0x60   : > { %755 = vmatprep.subr.bf16.mxu1 %v998_v0  ;;  %v466_v24 = vld [vmem:[#allocation5 + $0x70] sm:$0xff]  ;;  %v467_v25 = vld [vmem:[#allocation5 + $0x78] sm:$0xff]  ;;  %v762_v26 = vpack.c.bf16 %v386_v23, %v385_v22  ;;  %v676_v39 = vld [vmem:[%s1265_s2] ss:$0 sm:$0xff]  ;;  %s912_s6 = scalar_lea.vmem %s911_s4, 256  ;;  %p913_p12 = scmp.lt.s32.totalorder %s1216_s9, %s911_s4 }
  0x61   : > { %v768_v27 = vpack.c.bf16 %v467_v25, %v466_v24  ;;  %v672_v28 = vld [vmem:[%s1184_s8 + $0x10] sm:$0xff]  ;;  %v674_v29 = vld [vmem:[%s1184_s8 + $0x18] sm:$0xff]  ;;  %p908_p6 = pnand %p907_p4, %p1121_p10  ;;  %p914_p11 = scmp.lt.s32.totalorder %s912_s6, %s906_s21 }
  0x62   : > { %751 = vmatpush3.bf16.msra.mxu0 %v750_v12 }
  0x63   : > { %757 = vmatpush3.bf16.msra.mxu1 %v756_v13  ;;  %758 = vmatprep.subr.bf16.mxu0 %v998_v0  ;;  %p909_p8 = pneg %p908_p6  ;;  %p915_p0 = por %p914_p11, %p913_p12 }
  0x64   : > { %764 = vmatprep.subr.bf16.mxu1 %v998_v0 }
  0x65   : > { %711 = vmatmul.mubr.msk.f32.vlgmr.msra.gmra.mrb[0].mxu0 %vm233_vm1, %v669_v18  ;;  %p916_p5 = pnand %p915_p0, %p909_p8 }
  0x66   : > { %722 = vmatmul.mubr.msk.f32.vlgmr.msra.gmra.mrb[0].mxu1 %vm233_vm1, %v221_v20  ;;  %760 = vmatpush3.bf16.msra.mxu0 %v759_v19 }
  0x67   : > { %766 = vmatpush3.bf16.msra.mxu1 %v765_v21  ;;  %761 = vmatprep.subr.bf16.mxu0 %v998_v0 }
  0x68   : > { %767 = vmatprep.subr.bf16.mxu1 %v998_v0  ;;  %732 = vmatprep.mubr.msk.f32.mxu0 %vm999_vm0, %v1000_v1 }
  0x69   : > { %743 = vmatprep.mubr.msk.f32.mxu1 %vm999_vm0, %v1000_v1 }
  0x6a   : > { %763 = vmatpush3.bf16.msra.mxu0 %v762_v26 }
  0x6b   : > { %769 = vmatpush3.bf16.msra.mxu1 %v768_v27 }
  0x6d   : > { %733 = vmatmul.mubr.msk.f32.vlgmr.msra.gmra.mrb[2].mxu0 %vm233_vm1, %v672_v28 }
  0x6e   : > { %744 = vmatmul.mubr.msk.f32.vlgmr.msra.gmra.mrb[2].mxu1 %vm233_vm1, %v674_v29 }
 0x138   : > { %v303_v30 = vpop.f32.mrb[0].mxu0 }
 0x139   : > { %v712_v31 = vpop.f32.mrb[1].mxu0  ;;  %v376_v32 = vpop.f32.mrb[0].mxu1 }
 0x13a   : > { %v377_v33 = vadd.f32 %v376_v32, %v303_v30  ;;  %v723_v34 = vpop.f32.mrb[1].mxu1 }
 0x140   : > { %v456_v35 = vpop.f32.mrb[2].mxu0 }
 0x141   : > { %v460_v36 = vadd.f32 %v456_v35, %v377_v33  ;;  %v734_v37 = vpop.f32.mrb[3].mxu0  ;;  %v537_v38 = vpop.f32.mrb[2].mxu1 }
 0x142   : > { %v745_v40 = vpop.f32.mrb[3].mxu1 }
 0x143   : > { %v541_v41 = vadd.f32 %v537_v38, %v460_v36 }
 0x145   : > { %v549_v42 = vadd.f32 %v676_v39, %v541_v41 }
 0x147   : > { %550 = vst [vmem:[%s220_s11] sm:$0xff] %v549_v42 }
 0x148   : > { %919 = shalt.err (!%p916_p5)
}
 0x149   : > { %s920_s30 = scalar_lea.hbm %s1214_s25, 128  ;;  %s924_s8 = scalar_lea.hbm %s1266_s3, 256 }
 0x14a   : > { %p921_p9 = scmp.ne.s32.totalorder %s1214_s25, %s920_s30  ;;  %p925_p3 = scmp.lt.u32.totalorder %s1214_s25, %s1266_s3 }
 0x14b   : > { %p926_p7 = scmp.lt.u32.totalorder %s924_s8, %s920_s30  ;;  %p928_p4 = scmp.lt.u32.totalorder %s920_s30, %s1214_s25 }
 0x14c   : > { %p922_p1 = pnand %p921_p9, %p1121_p10 }
 0x14d   : > { %p927_p13 = por %p926_p7, %p925_p3 }
 0x14e   : > { %p923_p2 = pneg %p922_p1 }
 0x14f   : > { %p929_p6 = por %p928_p4, %p927_p13 }
 0x151   : > { %p930_p8 = pnand %p929_p6, %p923_p2 }
 0x153   : > { %933 = shalt.err (!%p930_p8)
}
 0x154   : > { %776 = dma.vmem_to_hbm [thread:$0]  (%p1121_p10), %s1216_s9, 128, %s1214_s25, %s552_s26  }
 0x155 PF: > { %s578_s24 = sand.u32 1, %s972_s12   ;;  %p1284_p12 = scmp.ne.s32.totalorder %s1274_s23, 0 }
 0x156   : > { %p1285_p11 = scmp.ge.s32.totalorder %s992_s17, 2  ;;  %s579_s10 = scalar_lea.sflag [#allocation4], %s578_s24 }
 0x158   : > { %p787_p0 = pnand %p1285_p11, %p1284_p12 }
 0x15a   : > { %967 = dma.done.wait (!%p787_p0), %s579_s10, 128  }
 0x15b   : > { %969 = vsyncadd (!%p787_p0), %s579_s10, 4294967168  ;;  %s20_s17 = sadd.s32 1, %s992_s17   ;;  %s1286_s12 = smov %s976_s13 }
 0x15c   : > { %p17_p5 = scmp.ge.s32.totalorder %s20_s17, 4   ;;  %s1287_s13 = smov %s980_s14 }
 0x15d   : > { %s1288_s14 = smov %s1130_s5  ;;  %s1289_s15 = smov %s988_s16 }
 0x15e   : > { %s1290_s16 = smov %s1292_s28  ;;  %19 = sbr.rel (!%p17_p5) target bundleno = 7 (0x7), region = 87 }
 0x165   :  { %584 = vsyncpa [#allocation3], 1 }
 0x166   :  { %586 = vsyncpa [#allocation3 + $0x1], 1 }
 0x167   :  { %587 = vsyncpa [#allocation6], 1 }
 0x168   :  { %588 = vsyncpa [#allocation4], 1 }
 0x169   :  { %590 = vsyncpa [#allocation4 + $0x1], 1 }

</bundles_post_ra>
